<compile_context>
chip_gen: v7x
topology: tpu7x:2x2x1
jax: 0.10.0
libtpu: 0.0.40
codegen_flags: <defaults>
</compile_context>

<pallas_src>
import math

import jax
import jax.numpy as jnp
from jax.experimental import pallas as pl
from jax.experimental.pallas import tpu as pltpu


# --------------------------------------------------------------------------- #
# Permutation canonicalization (pure Python, trace-time only).
# --------------------------------------------------------------------------- #
def _minimal_permutation(shape, order):
    """Drop size-1 axes and coalesce runs of axes that remain adjacent under the
    permutation.  Returns (min_in_shape, min_order) such that

        transpose(x.reshape(min_in_shape), min_order).reshape(perm_shape)

    equals transpose(x, order) element-for-element (all reshapes contiguous)."""
    keep = [ax for ax in range(len(shape)) if shape[ax] != 1]
    if not keep:
        return (), ()
    red_pos = {ax: i for i, ax in enumerate(keep)}
    red_shape = [shape[ax] for ax in keep]
    red_order = [red_pos[ax] for ax in order if shape[ax] != 1]

    groups = []  # runs of reduced input axes, listed in *output* order
    for ax in red_order:
        if groups and groups[-1][-1] + 1 == ax:
            groups[-1].append(ax)
        else:
            groups.append([ax])

    in_order_groups = sorted(groups, key=lambda g: g[0])
    min_in_shape = tuple(
        math.prod(red_shape[a] for a in g) for g in in_order_groups
    )
    rank_of = {tuple(g): i for i, g in enumerate(in_order_groups)}
    min_order = tuple(rank_of[tuple(g)] for g in groups)
    return min_in_shape, min_order


# --------------------------------------------------------------------------- #
# Per-generation VMEM budget.
# --------------------------------------------------------------------------- #
def _tpu_vmem_capacity_bytes():
    try:
        info = pltpu.get_tpu_info()
        cap = int(getattr(info, "vmem_capacity_bytes", 0) or 0)
        if cap > 0:
            return cap
    except Exception:
        pass
    return 64 * 1024 * 1024  # conservative (v7x-sized) default


def _align_tile(dim, target, granule):
    """Full dim when it fits the target; otherwise the largest multiple of
    `granule` not exceeding the target (>= granule).  Edge blocks are masked."""
    target = max(int(target), 1)
    if dim <= target:
        return dim
    return max(granule, (target // granule) * granule)


def _grid_extents(shape, perm, t_a, t_b, lead_block):
    nd = len(shape)
    n_lead = nd - 2
    ext = []
    for j in range(n_lead):
        dim = shape[perm[j]]
        s = lead_block[j]
        ext.append(1 if s >= dim else (dim if s <= 1 else pl.cdiv(dim, s)))
    ext.append(pl.cdiv(shape[perm[-2]], t_a))
    ext.append(pl.cdiv(shape[perm[-1]], t_b))
    return tuple(ext)


def _choose_blocks(shape, perm, itemsize, *, transpose_path, budget_bytes):
    """Pick (t_a, t_b, lead_block) so one block is ~budget_bytes, output stores
    are lane-dense whenever the shape allows, and the grid never degenerates to
    a single step when there is something to split."""
    nd = len(shape)
    n_lead = nd - 2
    a_ax, b_ax = perm[-2], perm[-1]
    A, B = shape[a_ax], shape[b_ax]
    pack = max(1, 4 // max(1, itemsize))
    sub_g = 8 * pack          # sublane granule for this dtype
    lane_g = 128
    budget_elems = max(lane_g * sub_g, budget_bytes // itemsize)

    if transpose_path:
        # Output tile is (t_a, t_b); t_a is also the input lane axis, so keep
        # both 128-aligned (or full-dim) and roughly square within the budget.
        side = max(lane_g, int(math.isqrt(budget_elems)))
        t_a = _align_tile(A, side, lane_g)
        t_b = _align_tile(B, side, lane_g)
        if t_a == A and t_b < B:
            t_b = _align_tile(B, max(lane_g, budget_elems // max(t_a, 1)), lane_g)
        elif t_b == B and t_a < A:
            t_a = _align_tile(A, max(lane_g, budget_elems // max(t_b, 1)), lane_g)
    else:
        # Copy path: the minor (lane) axis is shared by input and output ->
        # make it as wide as possible, spend the remaining budget on rows.
        t_b = _align_tile(B, budget_elems, lane_g)
        if budget_elems // t_b < sub_g and t_b > lane_g:
            t_b = _align_tile(B, max(lane_g, budget_elems // sub_g), lane_g)
        t_a = _align_tile(A, max(1, budget_elems // t_b), sub_g)

    t_a = min(t_a, A)
    t_b = min(t_b, B)

    # Fold leading output dims into the block (innermost-out, whole dims only)
    # while staying within the byte budget.  Folded axes must keep increasing
    # input order below min(a_ax, b_ax) so the kernel tile needs no extra
    # relayout (copy stays a copy; transpose stays a batched minor swap).
    lead_block = [1] * n_lead
    tile_elems = t_a * t_b
    limit = min(a_ax, b_ax)
    for j in range(n_lead - 1, -1, -1):
        if tile_elems >= budget_elems:
            break
        in_ax = perm[j]
        if in_ax >= limit:
            continue
        dim = shape[in_ax]
        if dim <= 1 or tile_elems * dim > budget_elems:
            continue
        lead_block[j] = dim
        tile_elems *= dim
        limit = in_ax

    # Keep >= 2 grid steps when possible so both v7x TensorCores get work.
    if all(e == 1 for e in _grid_extents(shape, perm, t_a, t_b, lead_block)):
        gran_a = lane_g if transpose_path else sub_g
        if t_a >= 2 * gran_a:
            t_a = max(gran_a, ((t_a // 2) // gran_a) * gran_a)
        elif t_b >= 2 * lane_g:
            t_b = max(lane_g, ((t_b // 2) // lane_g) * lane_g)
        else:
            folded = [j for j in range(n_lead) if lead_block[j] > 1]
            if folded:
                j = min(folded, key=lambda jj: shape[perm[jj]])
                lead_block[j] = 1  # un-fold -> grid axis of extent = dim >= 2

    return t_a, t_b, lead_block


# --------------------------------------------------------------------------- #
# Tiled permute: the input lane axis lands in the output's two minor positions.
# --------------------------------------------------------------------------- #
def _tiled_permute(x, perm):
    shape = x.shape
    nd = len(shape)
    n_lead = nd - 2
    out_shape = tuple(shape[p] for p in perm)
    a_ax, b_ax = perm[-2], perm[-1]
    assert max(a_ax, b_ax) == nd - 1
    transpose_path = a_ax > b_ax       # input lane axis becomes out[-2]
    itemsize = x.dtype.itemsize

    cap = _tpu_vmem_capacity_bytes()
    budget = min(8 << 20, cap // 16)   # per-block byte budget (per buffer)
    vmem_limit = int(min(8 * budget + (2 << 20), (cap * 3) // 4))

    t_a, t_b, lead_block = _choose_blocks(
        shape, perm, itemsize, transpose_path=transpose_path, budget_bytes=budget)

    inv = {perm[j]: j for j in range(nd)}  # input axis -> output position

    def build_call(lead_sizes, buffered_input):
        def lead_blk(j):
            s = lead_sizes[j]
            return None if s <= 1 else s

        out_block = tuple(lead_blk(j) for j in range(n_lead)) + (t_a, t_b)
        in_block = tuple(
            t_a if k == a_ax else (t_b if k == b_ax else lead_blk(inv[k]))
            for k in range(nd))
        grid = _grid_extents(shape, perm, t_a, t_b, lead_sizes)

        def out_index_map(*g):
            return g

        def in_index_map(*g):
            return tuple(g[inv[k]] for k in range(nd))

        if transpose_path:
            # Batched minor-dim swap only (XLU work, no N-D relayout).
            def kernel(x_ref, o_ref):
                o_ref[...] = jnp.swapaxes(x_ref[...], -1, -2)
        else:
            # Lane axis untouched: straight VMEM copy; the permute is done
            # purely by DMA addressing through the index maps.
            def kernel(x_ref, o_ref):
                o_ref[...] = x_ref[...]

        in_kwargs = {}
        if buffered_input:
            # Deeper input pipelining hides the strided short-row gather
            # latency of the transpose-path input DMAs.
            in_kwargs["pipeline_mode"] = pl.Buffered(3)
        in_spec = pl.BlockSpec(in_block, in_index_map, **in_kwargs)

        return pl.pallas_call(
            kernel,
            out_shape=jax.ShapeDtypeStruct(out_shape, x.dtype),
            grid=grid,
            in_specs=[in_spec],
            out_specs=pl.BlockSpec(out_block, out_index_map),
            compiler_params=pltpu.CompilerParams(
                dimension_semantics=("parallel",) * len(grid),
                vmem_limit_bytes=vmem_limit),
            cost_estimate=pl.CostEstimate(
                flops=0, transcendentals=0,
                bytes_accessed=2 * x.size * itemsize),
        )(x)

    # Preferred config first, then progressively more conservative fallbacks so
    # the kernel always compiles (Buffered(3) and folded/batched tiles are perf
    # features, not correctness requirements).
    candidates = [(lead_block, transpose_path)]
    if transpose_path:
        candidates.append((lead_block, False))
    if any(s > 1 for s in lead_block):
        candidates.append(([1] * n_lead, False))

    for i, (lb, buf) in enumerate(candidates):
        try:
            return build_call(lb, buf)
        except Exception:
            if i == len(candidates) - 1:
                raise


# --------------------------------------------------------------------------- #
# Lane axis moves to a non-trailing output position: two lane-friendly passes.
# --------------------------------------------------------------------------- #
def _decomposed_permute(x, perm):
    nd = len(perm)
    m = nd - 1               # input lane axis
    t = perm[-1]             # input axis that becomes the final minor
    others = [ax for ax in perm if ax not in (m, t)]    # final relative order
    perm1 = tuple(others) + (m, t)                      # transpose-path pass
    y = _tiled_permute(x, perm1)

    p = perm.index(m)        # final output position of the input lane axis
    base = list(range(nd - 2))
    perm2 = tuple(base[:p] + [nd - 2] + base[p:] + [nd - 1])   # copy-path pass
    return _tiled_permute(y, perm2)


# --------------------------------------------------------------------------- #
# Public wrapper: Pallas equivalent of Permute(before, after)(x).
# --------------------------------------------------------------------------- #
def permute_pallas(x, before, after):
    order = tuple(before.index(a) for a in after if a is not None)
    extra = tuple(i for i, a in enumerate(after) if a is None)
    assert len(order) == x.ndim, "permutation order must cover all input dims"
    assert sorted(order) == list(range(x.ndim)), "order must be a permutation"

    out_perm_shape = tuple(x.shape[i] for i in order)
    min_shape, min_order = _minimal_permutation(x.shape, order)

    if len(min_order) <= 1:
        # Effectively the identity permutation: metadata-only.
        y = jnp.reshape(x, out_perm_shape)
    else:
        xm = jnp.reshape(x, min_shape)                  # free contiguous reshape
        nd = len(min_shape)
        if nd - 1 in (min_order[-1], min_order[-2]):
            ym = _tiled_permute(xm, min_order)
        else:
            ym = _decomposed_permute(xm, min_order)
        y = jnp.reshape(ym, out_perm_shape)             # free contiguous reshape

    # Insert singleton dims for `None` entries (torch's unsqueeze_ loop).
    for i in extra:
        y = jnp.expand_dims(y, axis=i)
    return y


if __name__ == "__main__":
    key = jax.random.PRNGKey(0)
    x = jax.random.normal(key, (2, 4, 16, 16), dtype=jnp.float32)   # NCHW
    before = ("n", "c", "h", "w")

    # Case 1 (the module's config): NCHW -> (N, H, W, 1, C).
    # Lane axis becomes the output's second-minor -> batched transpose path
    # with the batch (N) folded into the block.
    after1 = ("n", "h", "w", None, "c")
    out1 = jax.block_until_ready(permute_pallas(x, before, after1))
    ref1 = jnp.expand_dims(jnp.transpose(x, (0, 2, 3, 1)), axis=3)
    assert out1.shape == ref1.shape, (out1.shape, ref1.shape)
    assert out1.dtype == ref1.dtype
    assert bool(jnp.all(out1 == ref1))

    # Case 2: NCHW -> CNHW. Lane axis untouched -> wide-minor pure copy path.
    after2 = ("c", "n", "h", "w")
    out2 = jax.block_until_ready(permute_pallas(x, before, after2))
    ref2 = jnp.transpose(x, (1, 0, 2, 3))
    assert out2.shape == ref2.shape, (out2.shape, ref2.shape)
    assert bool(jnp.all(out2 == ref2))

    # Case 3: lane axis moves to the front -> two-pass decomposition
    # (replaces the old whole-slab fallback that could not fit VMEM).
    x3 = jax.random.normal(key, (2, 4, 8, 16), dtype=jnp.float32)
    before3 = ("a", "b", "c", "d")
    after3 = ("d", "a", "c", "b")
    out3 = jax.block_until_ready(permute_pallas(x3, before3, after3))
    ref3 = jnp.transpose(x3, (3, 0, 2, 1))
    assert out3.shape == ref3.shape, (out3.shape, ref3.shape)
    assert bool(jnp.all(out3 == ref3))

    print("KERNEL_OK")
</pallas_src>

<mosaic_0001>
module attributes {stable_mosaic.version = 11 : i64} {
  func.func @kernel(%arg0: i32, %arg1: i32, %arg2: i32, %arg3: memref<2x4x128xf32, #tpu.memory_space<vmem>>, %arg4: memref<2x128x4xf32, #tpu.memory_space<vmem>>) attributes {dimension_semantics = [#tpu.dimension_semantics<parallel>, #tpu.dimension_semantics<parallel>, #tpu.dimension_semantics<parallel>], iteration_bounds = array<i64: 1, 2, 1>, scalar_prefetch = 0 : i64, scratch_operands = 0 : i64, tpu.core_type = #tpu.core_type<tc>, window_params = [{transform_indices = @transform_0, window_bounds = array<i64: 2, 4, 128>}, {transform_indices = @transform_1, window_bounds = array<i64: 2, 128, 4>}]} {
    %c0 = arith.constant 0 : index
    %c0_0 = arith.constant 0 : index
    %c0_1 = arith.constant 0 : index
    %0 = vector.load %arg3[%c0, %c0_0, %c0_1] : memref<2x4x128xf32, #tpu.memory_space<vmem>>, vector<2x4x128xf32>
    %1 = tpu.transpose %0, [0, 2, 1] : vector<2x4x128xf32> -> vector<2x128x4xf32>
    %c0_2 = arith.constant 0 : index
    %c0_3 = arith.constant 0 : index
    %c0_4 = arith.constant 0 : index
    %2 = vector.load %arg4[%c0_2, %c0_3, %c0_4] : memref<2x128x4xf32, #tpu.memory_space<vmem>>, vector<2x128x4xf32>
    tpu.vector_store %arg4[%c0_2, %c0_3, %c0_4], %1 {strides = array<i32>} : memref<2x128x4xf32, #tpu.memory_space<vmem>>, vector<2x128x4xf32>,
    return
  }
  func.func @transform_0(%arg0: i32, %arg1: i32, %arg2: i32) -> (i32, i32, i32) {
    %c0_i32 = arith.constant 0 : i32
    return %arg0, %arg2, %arg1 : i32, i32, i32
  }
  func.func @transform_1(%arg0: i32, %arg1: i32, %arg2: i32) -> (i32, i32, i32) {
    %c0_i32 = arith.constant 0 : i32
    return %arg0, %arg1, %arg2 : i32, i32, i32
  }
}

module attributes {stable_mosaic.version = 11 : i64} {
  func.func @kernel(%arg0: i32, %arg1: i32, %arg2: i32, %arg3: memref<1x4x128xf32, #tpu.memory_space<vmem>>, %arg4: memref<1x128x4xf32, #tpu.memory_space<vmem>>) attributes {dimension_semantics = [#tpu.dimension_semantics<parallel>, #tpu.dimension_semantics<parallel>, #tpu.dimension_semantics<parallel>], iteration_bounds = array<i64: 2, 2, 1>, scalar_prefetch = 0 : i64, scratch_operands = 0 : i64, tpu.core_type = #tpu.core_type<tc>, window_params = [{transform_indices = @transform_0, window_bounds = array<i64: 1, 4, 128>}, {transform_indices = @transform_1, window_bounds = array<i64: 1, 128, 4>}]} {
    %c0 = arith.constant 0 : index
    %c0_0 = arith.constant 0 : index
    %c0_1 = arith.constant 0 : index
    %0 = vector.load %arg3[%c0, %c0_0, %c0_1] : memref<1x4x128xf32, #tpu.memory_space<vmem>>, vector<1x4x128xf32>
    %1 = vector.shape_cast %0 : vector<1x4x128xf32> to vector<4x128xf32>
    %2 = tpu.transpose %1, [1, 0] : vector<4x128xf32> -> vector<128x4xf32>
    %c0_2 = arith.constant 0 : index
    %c0_3 = arith.constant 0 : index
    %c0_4 = arith.constant 0 : index
    %3 = vector.load %arg4[%c0_2, %c0_3, %c0_4] : memref<1x128x4xf32, #tpu.memory_space<vmem>>, vector<1x128x4xf32>
    %4 = vector.shape_cast %3 : vector<1x128x4xf32> to vector<128x4xf32>
    %5 = vector.shape_cast %2 : vector<128x4xf32> to vector<1x128x4xf32>
    tpu.vector_store %arg4[%c0_2, %c0_3, %c0_4], %5 {strides = array<i32>} : memref<1x128x4xf32, #tpu.memory_space<vmem>>, vector<1x128x4xf32>,
    return
  }
  func.func @transform_0(%arg0: i32, %arg1: i32, %arg2: i32) -> (i32, i32, i32) {
    %c0_i32 = arith.constant 0 : i32
    return %arg0, %arg2, %arg1 : i32, i32, i32
  }
  func.func @transform_1(%arg0: i32, %arg1: i32, %arg2: i32) -> (i32, i32, i32) {
    %c0_i32 = arith.constant 0 : i32
    return %arg0, %arg1, %arg2 : i32, i32, i32
  }
}

</mosaic_0001>

<bundles_post_ra>
// kernel: tpu_custom_call.1
= control target key start
LH: loop header
LB: loop body
LE: loop exit
PB: predicated region body
PF: predicated region fallthrough
CT: control target
= control target key end

     0   :  { %6 = vsyncpa [#allocation3], 0  ;;  %s948_s0 = inlined_call_operand.hbm [shape: f32[2,4,256], index: 0, kind: input, shape index: {}]   ;;  %s949_s1 = inlined_call_operand.vmem [shape: f32[2,256,4], index: 1, kind: output, shape index: {}]  }
   0x1   :  { %8 = vsyncpa [#allocation3 + $0x1], 0  ;;  %s685_s6 = smov 0   ;;  %s687_s7 = smov 0  }
   0x2   :  { %s689_s8 = smov 0   ;;  %s691_s9 = smov 0  }
   0x3   :  { %s693_s10 = smov 0   ;;  %s695_s11 = smov 0  }
   0x4 LB: > { %s515_s12 = sadd.s32 4294967295, %s669_s11   ;;  %s29_s13 = sadd.s32 1, %s665_s10  ;;  %s669_s11 = sphi %s695_s11, %s14_s11   ;;  %s665_s10 = sphi %s693_s10, %s960_s10   ;;  %s661_s9 = sphi %s691_s9, %s959_s9   ;;  %s657_s8 = sphi %s689_s8, %s958_s8   ;;  %s653_s7 = sphi %s687_s7, %s957_s7   ;;  %s649_s6 = sphi %s685_s6, %s956_s6  }
   0x5   : > { %p31_p0 = scmp.ge.s32.totalorder %s29_s13, 2  ;;  %s44_s14 = sadd.s32 1, %s657_s8 }
   0x6   : > { %p51_p1 = scmp.ne.s32.totalorder %s657_s8, %s653_s7  ;;  %p52_p2 = scmp.eq.s32.totalorder %s669_s11, 0 }
   0x7   : > { %s962_s13 = smov (%p31_p0, %s29_s13), 0  ;;  %p57_p4 = scmp.ne.s32.totalorder %s653_s7, %s649_s6 }
   0x8   : > { %p721_p3 = por %p52_p2, %p51_p1  ;;  %s40_s16 = ssub.s32 %s665_s10, %s962_s13 }
   0x9   : > { %p58_p5 = scmp.eq.s32.totalorder %s515_s12, 0  ;;  %p42_p6 = scmp.eq.s32.totalorder %s40_s16, 0 }
   0xa   : > { %p85_p7 = scmp.eq.s32.totalorder %s515_s12, 1  ;;  %p536_p10 = scmp.lt.s32.totalorder %s669_s11, 2 }
   0xb   : > { %p728_p8 = por %p58_p5, %p57_p4  ;;  %s111_s20 = sand.u32 1, %s657_s8  }
   0xc   : > { %s733_s18 = scalar_select %p42_p6, %s657_s8, %s44_s14  }
   0xd   : > { %p735_p9 = por %p85_p7, %p51_p1  ;;  %s520_s21 = sshll.u32 %s665_s10, 6 }
   0xe   : > { %s519_s22 = sshll.u32 %s111_s20, 3  ;;  %s745_s25 = scalar_lea.hbm %s948_s0, %s520_s21 }
   0xf   : > { %s952_s19 = scalar_select %p735_p9, 1, 0 }
  0x10   : > { %s115_s26 = scalar_lea.vmem [#allocation2], %s519_s22  ;;  %p749_p11 = pnand %p536_p10, %p721_p3 }
  0x11   : > { %s126_s27 = sshll.u32 %s115_s26, 4  ;;  %s756_s29 = scalar_lea.sflag [#allocation3], %s111_s20  ;;  %s753_s27 = int_to_ptr.vmem [resolvable:$true] %s126_s27 }
  0x12   : > { %s589_s30 = scalar_lea.hbm %s745_s25, 128  ;;  %p591_p0 = pneg %p749_p11 }
  0x13   : > { %p590_p13 = scmp.ne.s32.totalorder %s745_s25, %s589_s30  ;;  %s594_s4 = scalar_lea.hbm %s948_s0, 256 }
  0x14   : > { %p595_p3 = scmp.lt.u32.totalorder %s745_s25, %s948_s0  ;;  %p596_p4 = scmp.lt.u32.totalorder %s594_s4, %s589_s30 }
  0x15   : > { %p592_p1 = pnand %p591_p0, %p590_p13  ;;  %p598_p6 = scmp.lt.u32.totalorder %s589_s30, %s745_s25 }
  0x16   : > { %p597_p5 = por %p596_p4, %p595_p3 }
  0x17   : > { %p593_p2 = pneg %p592_p1 }
  0x18   : > { %p599_p7 = por %p598_p6, %p597_p5 }
  0x1a   : > { %p600_p10 = pnand %p599_p7, %p593_p2 }
  0x1c   : > { %603 = shalt.err (!%p600_p10)
}
  0x1d   : > { %s604_s12 = scalar_lea.vmem %s753_s27, 128  ;;  %s671_s14 = smov [#allocation2]  }
  0x1e   : > { %p605_p13 = scmp.ne.s32.totalorder %s753_s27, %s604_s12  ;;  %s609_s15 = sshll.u32 %s671_s14, 4  ;;  %s610_s15 = int_to_ptr.vmem [resolvable:$false] %s609_s15 }
  0x1f   : > { %s611_s16 = scalar_lea.vmem %s610_s15, 256  ;;  %p612_p9 = scmp.lt.s32.totalorder %s753_s27, %s610_s15 }
  0x20   : > { %p607_p1 = pnand %p605_p13, %p591_p0  ;;  %p613_p3 = scmp.lt.s32.totalorder %s611_s16, %s604_s12 }
  0x22   : > { %p608_p12 = pneg %p607_p1  ;;  %p614_p4 = por %p613_p3, %p612_p9 }
  0x24   : > { %p615_p5 = pnand %p614_p4, %p608_p12 }
  0x26   : > { %618 = shalt.err (!%p615_p5)
}
  0x27   : > { %s672_s20 = smov 128   ;;  %s673_s21 = smov 64  }
  0x28   : > { %s674_s22 = smov 4   ;;  %p134_p0 = scmp.lt.s32.totalorder %s669_s11, 3 }
  0x29   : > { %535 = dma.hbm_to_vmem [thread:$0]  (!%p749_p11), %s745_s25, 128, %s753_s27, %s756_s29, %s672_s20, %s673_s21, %s674_s22  }
  0x2a   : > { %p954_p2 = scmp.ge.s32.totalorder %s669_s11, 1 }
  0x2c   : > { %p135_p6 = pnand %p954_p2, %p134_p0 }
  0x2d   : > { %s140_s23 = sand.u32 (!%p135_p6), 1, %s653_s7  }
  0x2e   : > { %138 = sbr.rel (%p135_p6) target bundleno = 317 (0x13d), region = 24  ;;  %s522_s24 = sshll.u32 (!%p135_p6), %s140_s23, 3 }
  0x2f   : > { %s141_s26 = scalar_lea.sflag (!%p135_p6), [#allocation3], %s140_s23  ;;  %s144_s30 = scalar_lea.vmem (!%p135_p6), [#allocation2], %s522_s24 }
  0x35   : > { %644 = dma.done.wait (%p728_p8), %s141_s26, 128  }
  0x36   : > { %646 = vsyncadd (%p728_p8), %s141_s26, 4294967168  ;;  %v165_v0 = vld [vmem:[%s144_s30] sm:$0xf]  ;;  %v166_v1 = vld [vmem:[%s144_s30 + $0x4] sm:$0xf]  ;;  %s523_s25 = sshll.u32 %s140_s23, 8 }
  0x37   : > { %167 = vxpose.xlu0.b32.start.end [1/1] (short) %v165_v0, 128  ;;  %vm231_vm0 = vcmask 31744   ;;  %s792_s27 = scalar_lea.vmem [#allocation4], %s523_s25  ;;  %p955_p8 = scmp.ne.s32.totalorder %s952_s19, 0 }
  0x38   : > { %s529_s17 = sshll.u32 (%p955_p8), %s661_s9, 7 }
  0x39   : > { %s867_s2 = scalar_lea.vmem (%p955_p8), %s949_s1, %s529_s17 }
  0x74   : > { %199 = vxpose.xlu0.b32.start.end [1/1] (short) %v166_v1, 128 }
  0xb7   : > { %v183_v2 = vpop.trf.xlu0 }
  0xb8   : > { %232 = vst.msk [vmem:[%s792_s27] sm:$0xff] %vm231_vm0, %v183_v2 }
  0xbb   : > { %v184_v3 = vpop.trf.xlu0 }
  0xbc   : > { %233 = vst.msk [vmem:[%s792_s27 + $0x8] sm:$0xff] %vm231_vm0, %v184_v3 }
  0xbf   : > { %v185_v4 = vpop.trf.xlu0  ;;  %v367_v34 = vld [vmem:[%s792_s27] sm:$0xff] (%p955_p8) }
  0xc0   : > { %234 = vst.msk [vmem:[%s792_s27 + $0x10] sm:$0xff] %vm231_vm0, %v185_v4  ;;  %368 = vst [vmem:[%s867_s2] sm:$0xff] (%p955_p8), %v367_v34 }
  0xc3   : > { %v186_v5 = vpop.trf.xlu0  ;;  %v369_v35 = vld [vmem:[%s792_s27 + $0x8] sm:$0xff] (%p955_p8) }
  0xc4   : > { %235 = vst.msk [vmem:[%s792_s27 + $0x18] sm:$0xff] %vm231_vm0, %v186_v5  ;;  %370 = vst [vmem:[%s867_s2 + $0x8] sm:$0xff] (%p955_p8), %v369_v35 }
  0xc7   : > { %v187_v6 = vpop.trf.xlu0  ;;  %v371_v36 = vld [vmem:[%s792_s27 + $0x10] sm:$0xff] (%p955_p8) }
  0xc8   : > { %236 = vst.msk [vmem:[%s792_s27 + $0x20] sm:$0xff] %vm231_vm0, %v187_v6  ;;  %372 = vst [vmem:[%s867_s2 + $0x10] sm:$0xff] (%p955_p8), %v371_v36 }
  0xcb   : > { %v188_v7 = vpop.trf.xlu0  ;;  %v373_v37 = vld [vmem:[%s792_s27 + $0x18] sm:$0xff] (%p955_p8) }
  0xcc   : > { %237 = vst.msk [vmem:[%s792_s27 + $0x28] sm:$0xff] %vm231_vm0, %v188_v7  ;;  %374 = vst [vmem:[%s867_s2 + $0x18] sm:$0xff] (%p955_p8), %v373_v37 }
  0xcf   : > { %v189_v8 = vpop.trf.xlu0  ;;  %v375_v38 = vld [vmem:[%s792_s27 + $0x20] sm:$0xff] (%p955_p8) }
  0xd0   : > { %238 = vst.msk [vmem:[%s792_s27 + $0x30] sm:$0xff] %vm231_vm0, %v189_v8  ;;  %376 = vst [vmem:[%s867_s2 + $0x20] sm:$0xff] (%p955_p8), %v375_v38 }
  0xd3   : > { %v190_v9 = vpop.trf.xlu0  ;;  %v377_v39 = vld [vmem:[%s792_s27 + $0x28] sm:$0xff] (%p955_p8) }
  0xd4   : > { %239 = vst.msk [vmem:[%s792_s27 + $0x38] sm:$0xff] %vm231_vm0, %v190_v9  ;;  %378 = vst [vmem:[%s867_s2 + $0x28] sm:$0xff] (%p955_p8), %v377_v39 }
  0xd7   : > { %v191_v10 = vpop.trf.xlu0  ;;  %v379_v40 = vld [vmem:[%s792_s27 + $0x30] sm:$0xff] (%p955_p8) }
  0xd8   : > { %240 = vst.msk [vmem:[%s792_s27 + $0x40] sm:$0xff] %vm231_vm0, %v191_v10  ;;  %380 = vst [vmem:[%s867_s2 + $0x30] sm:$0xff] (%p955_p8), %v379_v40 }
  0xdb   : > { %v192_v11 = vpop.trf.xlu0  ;;  %v381_v41 = vld [vmem:[%s792_s27 + $0x38] sm:$0xff] (%p955_p8) }
  0xdc   : > { %241 = vst.msk [vmem:[%s792_s27 + $0x48] sm:$0xff] %vm231_vm0, %v192_v11  ;;  %382 = vst [vmem:[%s867_s2 + $0x38] sm:$0xff] (%p955_p8), %v381_v41 }
  0xdf   : > { %v193_v12 = vpop.trf.xlu0  ;;  %v383_v42 = vld [vmem:[%s792_s27 + $0x40] sm:$0xff] (%p955_p8) }
  0xe0   : > { %242 = vst.msk [vmem:[%s792_s27 + $0x50] sm:$0xff] %vm231_vm0, %v193_v12  ;;  %384 = vst [vmem:[%s867_s2 + $0x40] sm:$0xff] (%p955_p8), %v383_v42 }
  0xe3   : > { %v194_v13 = vpop.trf.xlu0  ;;  %v385_v43 = vld [vmem:[%s792_s27 + $0x48] sm:$0xff] (%p955_p8) }
  0xe4   : > { %243 = vst.msk [vmem:[%s792_s27 + $0x58] sm:$0xff] %vm231_vm0, %v194_v13  ;;  %386 = vst [vmem:[%s867_s2 + $0x48] sm:$0xff] (%p955_p8), %v385_v43 }
  0xe7   : > { %v195_v14 = vpop.trf.xlu0  ;;  %v387_v44 = vld [vmem:[%s792_s27 + $0x50] sm:$0xff] (%p955_p8) }
  0xe8   : > { %244 = vst.msk [vmem:[%s792_s27 + $0x60] sm:$0xff] %vm231_vm0, %v195_v14  ;;  %388 = vst [vmem:[%s867_s2 + $0x50] sm:$0xff] (%p955_p8), %v387_v44 }
  0xeb   : > { %v196_v15 = vpop.trf.xlu0  ;;  %v389_v45 = vld [vmem:[%s792_s27 + $0x58] sm:$0xff] (%p955_p8) }
  0xec   : > { %245 = vst.msk [vmem:[%s792_s27 + $0x68] sm:$0xff] %vm231_vm0, %v196_v15  ;;  %390 = vst [vmem:[%s867_s2 + $0x58] sm:$0xff] (%p955_p8), %v389_v45 }
  0xef   : > { %v197_v16 = vpop.trf.xlu0  ;;  %v391_v46 = vld [vmem:[%s792_s27 + $0x60] sm:$0xff] (%p955_p8) }
  0xf0   : > { %246 = vst.msk [vmem:[%s792_s27 + $0x70] sm:$0xff] %vm231_vm0, %v197_v16  ;;  %392 = vst [vmem:[%s867_s2 + $0x60] sm:$0xff] (%p955_p8), %v391_v46 }
  0xf3   : > { %v198_v17 = vpop.trf.xlu0  ;;  %v393_v47 = vld [vmem:[%s792_s27 + $0x68] sm:$0xff] (%p955_p8) }
  0xf4   : > { %247 = vst.msk [vmem:[%s792_s27 + $0x78] sm:$0xff] %vm231_vm0, %v198_v17  ;;  %394 = vst [vmem:[%s867_s2 + $0x68] sm:$0xff] (%p955_p8), %v393_v47 }
  0xf7   : > { %v215_v18 = vpop.trf.xlu0  ;;  %v395_v48 = vld [vmem:[%s792_s27 + $0x70] sm:$0xff] (%p955_p8) }
  0xf8   : > { %248 = vst.msk [vmem:[%s792_s27 + $0x80] sm:$0xff] %vm231_vm0, %v215_v18  ;;  %396 = vst [vmem:[%s867_s2 + $0x70] sm:$0xff] (%p955_p8), %v395_v48 }
  0xfb   : > { %v216_v19 = vpop.trf.xlu0  ;;  %v397_v49 = vld [vmem:[%s792_s27 + $0x78] sm:$0xff] (%p955_p8) }
  0xfc   : > { %249 = vst.msk [vmem:[%s792_s27 + $0x88] sm:$0xff] %vm231_vm0, %v216_v19  ;;  %398 = vst [vmem:[%s867_s2 + $0x78] sm:$0xff] (%p955_p8), %v397_v49 }
  0xff   : > { %v217_v20 = vpop.trf.xlu0  ;;  %v399_v50 = vld [vmem:[%s792_s27 + $0x80] sm:$0xff] (%p955_p8) }
 0x100   : > { %250 = vst.msk [vmem:[%s792_s27 + $0x90] sm:$0xff] %vm231_vm0, %v217_v20  ;;  %400 = vst [vmem:[%s867_s2 + $0x100] sm:$0xff] (%p955_p8), %v399_v50 }
 0x103   : > { %v218_v21 = vpop.trf.xlu0  ;;  %v401_v51 = vld [vmem:[%s792_s27 + $0x88] sm:$0xff] (%p955_p8) }
 0x104   : > { %251 = vst.msk [vmem:[%s792_s27 + $0x98] sm:$0xff] %vm231_vm0, %v218_v21  ;;  %402 = vst [vmem:[%s867_s2 + $0x108] sm:$0xff] (%p955_p8), %v401_v51 }
 0x107   : > { %v219_v22 = vpop.trf.xlu0  ;;  %v403_v52 = vld [vmem:[%s792_s27 + $0x90] sm:$0xff] (%p955_p8) }
 0x108   : > { %252 = vst.msk [vmem:[%s792_s27 + $0xa0] sm:$0xff] %vm231_vm0, %v219_v22  ;;  %404 = vst [vmem:[%s867_s2 + $0x110] sm:$0xff] (%p955_p8), %v403_v52 }
 0x10b   : > { %v220_v23 = vpop.trf.xlu0  ;;  %v405_v53 = vld [vmem:[%s792_s27 + $0x98] sm:$0xff] (%p955_p8) }
 0x10c   : > { %253 = vst.msk [vmem:[%s792_s27 + $0xa8] sm:$0xff] %vm231_vm0, %v220_v23  ;;  %406 = vst [vmem:[%s867_s2 + $0x118] sm:$0xff] (%p955_p8), %v405_v53 }
 0x10f   : > { %v221_v24 = vpop.trf.xlu0  ;;  %v407_v54 = vld [vmem:[%s792_s27 + $0xa0] sm:$0xff] (%p955_p8) }
 0x110   : > { %254 = vst.msk [vmem:[%s792_s27 + $0xb0] sm:$0xff] %vm231_vm0, %v221_v24  ;;  %408 = vst [vmem:[%s867_s2 + $0x120] sm:$0xff] (%p955_p8), %v407_v54 }
 0x113   : > { %v222_v25 = vpop.trf.xlu0  ;;  %v409_v55 = vld [vmem:[%s792_s27 + $0xa8] sm:$0xff] (%p955_p8) }
 0x114   : > { %255 = vst.msk [vmem:[%s792_s27 + $0xb8] sm:$0xff] %vm231_vm0, %v222_v25  ;;  %410 = vst [vmem:[%s867_s2 + $0x128] sm:$0xff] (%p955_p8), %v409_v55 }
 0x117   : > { %v223_v26 = vpop.trf.xlu0  ;;  %v411_v56 = vld [vmem:[%s792_s27 + $0xb0] sm:$0xff] (%p955_p8) }
 0x118   : > { %256 = vst.msk [vmem:[%s792_s27 + $0xc0] sm:$0xff] %vm231_vm0, %v223_v26  ;;  %412 = vst [vmem:[%s867_s2 + $0x130] sm:$0xff] (%p955_p8), %v411_v56 }
 0x11b   : > { %v224_v27 = vpop.trf.xlu0  ;;  %v413_v57 = vld [vmem:[%s792_s27 + $0xb8] sm:$0xff] (%p955_p8) }
 0x11c   : > { %257 = vst.msk [vmem:[%s792_s27 + $0xc8] sm:$0xff] %vm231_vm0, %v224_v27  ;;  %414 = vst [vmem:[%s867_s2 + $0x138] sm:$0xff] (%p955_p8), %v413_v57 }
 0x11f   : > { %v225_v28 = vpop.trf.xlu0  ;;  %v415_v58 = vld [vmem:[%s792_s27 + $0xc0] sm:$0xff] (%p955_p8) }
 0x120   : > { %258 = vst.msk [vmem:[%s792_s27 + $0xd0] sm:$0xff] %vm231_vm0, %v225_v28  ;;  %416 = vst [vmem:[%s867_s2 + $0x140] sm:$0xff] (%p955_p8), %v415_v58 }
 0x123   : > { %v226_v29 = vpop.trf.xlu0  ;;  %v417_v59 = vld [vmem:[%s792_s27 + $0xc8] sm:$0xff] (%p955_p8) }
 0x124   : > { %259 = vst.msk [vmem:[%s792_s27 + $0xd8] sm:$0xff] %vm231_vm0, %v226_v29  ;;  %418 = vst [vmem:[%s867_s2 + $0x148] sm:$0xff] (%p955_p8), %v417_v59 }
 0x127   : > { %v227_v30 = vpop.trf.xlu0  ;;  %v419_v60 = vld [vmem:[%s792_s27 + $0xd0] sm:$0xff] (%p955_p8) }
 0x128   : > { %260 = vst.msk [vmem:[%s792_s27 + $0xe0] sm:$0xff] %vm231_vm0, %v227_v30  ;;  %420 = vst [vmem:[%s867_s2 + $0x150] sm:$0xff] (%p955_p8), %v419_v60 }
 0x12b   : > { %v228_v31 = vpop.trf.xlu0  ;;  %v421_v61 = vld [vmem:[%s792_s27 + $0xd8] sm:$0xff] (%p955_p8) }
 0x12c   : > { %261 = vst.msk [vmem:[%s792_s27 + $0xe8] sm:$0xff] %vm231_vm0, %v228_v31  ;;  %422 = vst [vmem:[%s867_s2 + $0x158] sm:$0xff] (%p955_p8), %v421_v61 }
 0x12e   : > { %270 = sbr.rel (!%p955_p8) target bundleno = 317 (0x13d), region = 32 }
 0x12f   : > { %v229_v32 = vpop.trf.xlu0  ;;  %v423_v62 = vld [vmem:[%s792_s27 + $0xe0] sm:$0xff] (%p955_p8) }
 0x130   : > { %262 = vst.msk [vmem:[%s792_s27 + $0xf0] sm:$0xff] %vm231_vm0, %v229_v32  ;;  %424 = vst [vmem:[%s867_s2 + $0x160] sm:$0xff] (%p955_p8), %v423_v62 }
 0x133   : > { %v230_v33 = vpop.trf.xlu0  ;;  %v425_v63 = vld [vmem:[%s792_s27 + $0xe8] sm:$0xff] (%p955_p8) }
 0x134   : > { %263 = vst.msk [vmem:[%s792_s27 + $0xf8] sm:$0xff] %vm231_vm0, %v230_v33  ;;  %426 = vst [vmem:[%s867_s2 + $0x168] sm:$0xff] (%p955_p8), %v425_v63 }
 0x137   : > { %v427_v0 = vld [vmem:[%s792_s27 + $0xf0] sm:$0xff] }
 0x138   : > { %428 = vst [vmem:[%s867_s2 + $0x170] sm:$0xff] %v427_v0 }
 0x13b   : > { %v429_v1 = vld [vmem:[%s792_s27 + $0xf8] sm:$0xff] }
 0x13c   : > { %430 = vst [vmem:[%s867_s2 + $0x178] sm:$0xff] %v429_v1 }
 0x13d PF: > { %s14_s11 = sadd.s32 1, %s669_s11   ;;  %s956_s6 = smov %s653_s7 }
 0x13e   : > { %p11_p9 = scmp.ge.s32.totalorder %s14_s11, 4   ;;  %s957_s7 = smov %s657_s8 }
 0x13f   : > { %s958_s8 = smov %s733_s18  ;;  %s959_s9 = smov %s665_s10 }
 0x140   : > { %s960_s10 = smov %s962_s13  ;;  %13 = sbr.rel (!%p11_p9) target bundleno = 4 (0x4), region = 102 }
 0x147   :  { %446 = vsyncpa [#allocation3], 1 }
 0x148   :  { %448 = vsyncpa [#allocation3 + $0x1], 1 }

// kernel: tpu_custom_call.1
= control target key start
LH: loop header
LB: loop body
LE: loop exit
PB: predicated region body
PF: predicated region fallthrough
CT: control target
= control target key end

     0   :  { %6 = vsyncpa [#allocation3], 0  ;;  %s722_s0 = inlined_call_operand.hbm [shape: f32[2,4,256], index: 0, kind: input, shape index: {}]   ;;  %s723_s1 = inlined_call_operand.vmem [shape: f32[2,256,4], index: 1, kind: output, shape index: {}]  }
   0x1   :  { %8 = vsyncpa [#allocation3 + $0x1], 0  ;;  %s537_s6 = smov 0   ;;  %s539_s7 = smov 0  }
   0x2   :  { %s541_s8 = smov 0   ;;  %s543_s9 = smov 0  }
   0x3   :  { %s545_s10 = smov 0   ;;  %s547_s11 = smov 0  }
   0x4   :  { %s549_s12 = smov 0   ;;  %s551_s13 = smov 0  }
   0x5 LB: > { %s342_s14 = sadd.s32 4294967295, %s524_s13   ;;  %s29_s15 = sadd.s32 1, %s516_s11  ;;  %s524_s13 = sphi %s551_s13, %s14_s13   ;;  %s520_s12 = sphi %s549_s12, %s735_s12   ;;  %s516_s11 = sphi %s547_s11, %s734_s11   ;;  %s512_s10 = sphi %s545_s10, %s733_s10   ;;  %s508_s9 = sphi %s543_s9, %s732_s9   ;;  %s504_s8 = sphi %s541_s8, %s731_s8   ;;  %s500_s7 = sphi %s539_s7, %s730_s7   ;;  %s496_s6 = sphi %s537_s6, %s729_s6  }
   0x6   : > { %p31_p0 = scmp.ge.s32.totalorder %s29_s15, 2  ;;  %s33_s16 = sadd.s32 1, %s520_s12 }
   0x7   : > { %s44_s17 = sadd.s32 1, %s504_s8  ;;  %p51_p1 = scmp.ne.s32.totalorder %s504_s8, %s500_s7 }
   0x8   : > { %s737_s15 = smov (%p31_p0, %s29_s15), 0  ;;  %s739_s16 = smov (!%p31_p0, %s33_s16), %s520_s12 }
   0x9   : > { %s40_s18 = ssub.s32 %s516_s11, %s737_s15  ;;  %p52_p2 = scmp.eq.s32.totalorder %s524_s13, 0 }
   0xa   : > { %p35_p3 = scmp.ge.s32.totalorder %s739_s16, 2  ;;  %p57_p4 = scmp.ne.s32.totalorder %s500_s7, %s496_s6 }
   0xb   : > { %p588_p5 = por %p52_p2, %p51_p1  ;;  %p58_p6 = scmp.eq.s32.totalorder %s342_s14, 0 }
   0xc   : > { %s741_s16 = smov (%p35_p3, %s739_s16), 0  ;;  %p362_p8 = scmp.lt.s32.totalorder %s524_s13, 4 }
   0xd   : > { %p594_p7 = por %p58_p6, %p57_p4  ;;  %s37_s21 = ssub.s32 %s520_s12, %s741_s16 }
   0xe   : > { %s41_s22 = sor.u32 %s40_s18, %s37_s21  ;;  %s111_s23 = sand.u32 1, %s504_s8  }
   0xf   : > { %p42_p9 = scmp.eq.s32.totalorder %s41_s22, 0  ;;  %s346_s24 = sshll.u32 %s111_s23, 2 }
  0x10   : > { %s347_s25 = sshll.u32 %s520_s12, 1  ;;  %s115_s29 = scalar_lea.vmem [#allocation2], %s346_s24 }
  0x11   : > { %s604_s26 = scalar_select %p42_p9, %s504_s8, %s44_s17  }
  0x12   : > { %s122_s27 = sadd.s32 %s516_s11, %s347_s25  ;;  %s126_s30 = sshll.u32 %s115_s29, 4  ;;  %s612_s30 = int_to_ptr.vmem [resolvable:$true] %s126_s30 }
  0x13   : > { %s348_s28 = sshll.u32 %s122_s27, 6  ;;  %p618_p10 = pnand %p362_p8, %p588_p5 }
  0x14   : > { %s610_s4 = scalar_lea.hbm %s722_s0, %s348_s28  ;;  %s112_s6 = scalar_lea.sflag [#allocation3], %s111_s23 }
  0x15   : > { %s428_s14 = scalar_lea.hbm %s610_s4, 64  ;;  %p430_p0 = pneg %p618_p10 }
  0x16   : > { %p429_p13 = scmp.ne.s32.totalorder %s610_s4, %s428_s14  ;;  %s433_s19 = scalar_lea.hbm %s722_s0, 256 }
  0x17   : > { %p434_p3 = scmp.lt.u32.totalorder %s610_s4, %s722_s0  ;;  %p435_p4 = scmp.lt.u32.totalorder %s433_s19, %s428_s14 }
  0x18   : > { %p431_p1 = pnand %p430_p0, %p429_p13  ;;  %p437_p6 = scmp.lt.u32.totalorder %s428_s14, %s610_s4 }
  0x19   : > { %p436_p5 = por %p435_p4, %p434_p3 }
  0x1a   : > { %p432_p2 = pneg %p431_p1 }
  0x1b   : > { %p438_p8 = por %p437_p6, %p436_p5 }
  0x1d   : > { %p439_p9 = pnand %p438_p8, %p432_p2 }
  0x1f   : > { %442 = shalt.err (!%p439_p9)
}
  0x20   : > { %s443_s23 = scalar_lea.vmem %s612_s30, 64  ;;  %s526_s24 = smov [#allocation2]  }
  0x21   : > { %p444_p13 = scmp.ne.s32.totalorder %s612_s30, %s443_s23  ;;  %s448_s25 = sshll.u32 %s526_s24, 4  ;;  %s449_s25 = int_to_ptr.vmem [resolvable:$false] %s448_s25 }
  0x22   : > { %s450_s27 = scalar_lea.vmem %s449_s25, 128  ;;  %p451_p12 = scmp.lt.s32.totalorder %s612_s30, %s449_s25 }
  0x23   : > { %p446_p1 = pnand %p444_p13, %p430_p0  ;;  %p452_p3 = scmp.lt.s32.totalorder %s450_s27, %s443_s23 }
  0x25   : > { %p447_p11 = pneg %p446_p1  ;;  %p453_p4 = por %p452_p3, %p451_p12 }
  0x27   : > { %p454_p5 = pnand %p453_p4, %p447_p11 }
  0x29   : > { %457 = shalt.err (!%p454_p5)
}
  0x2a   : > { %361 = dma.hbm_to_vmem [thread:$0]  (!%p618_p10), %s610_s4, 64, %s612_s30, %s112_s6  }
  0x2b   : > { %p727_p2 = scmp.lt.s32.totalorder %s524_s13, 5  ;;  %p728_p6 = scmp.ge.s32.totalorder %s524_s13, 1 }
  0x2d   : > { %p132_p0 = pnand %p728_p6, %p727_p2 }
  0x2e   : > { %s137_s28 = sand.u32 (!%p132_p0), 1, %s500_s7  }
  0x2f   : > { %135 = sbr.rel (%p132_p0) target bundleno = 246 (0xf6), region = 24  ;;  %s350_s29 = sshll.u32 (!%p132_p0), %s137_s28, 2 }
  0x30   : > { %s138_s2 = scalar_lea.sflag (!%p132_p0), [#allocation3], %s137_s28  ;;  %s141_s3 = scalar_lea.vmem (!%p132_p0), [#allocation2], %s350_s29 }
  0x36   : > { %491 = dma.done.wait (%p594_p7), %s138_s2, 64  }
  0x37   : > { %493 = vsyncadd (%p594_p7), %s138_s2, 4294967232  ;;  %v180_v0 = vld [vmem:[%s141_s3] sm:$0xf]  ;;  %s351_s30 = sshll.u32 %s508_s9, 4  ;;  %p168_p10 = scmp.lt.s32.totalorder %s512_s10, 1  ;;  %vm213_vm0 = vcmask 31744  }
  0x38   : > { %181 = vxpose.xlu0.b32.start.end [1/1] (short) %v180_v0, 128  ;;  %p170_p11 = scmp.lt.s32.totalorder %s351_s30, 31 }
  0x39   : > { %s743_s10 = smov (!%p168_p10, %s512_s10), 1 }
  0x3a   : > { %s745_s30 = smov (!%p170_p11, %s351_s30), 31  ;;  %s352_s4 = sshll.u32 %s743_s10, 5 }
  0x3b   : > { %s176_s5 = sadd.s32 %s352_s4, %s745_s30 }
  0x3c   : > { %s353_s6 = sshll.u32 %s176_s5, 3 }
  0x3d   : > { %s664_s18 = scalar_lea.vmem %s723_s1, %s353_s6 }
  0xb8   : > { %v197_v1 = vpop.trf.xlu0 }
  0xb9   : > { %214 = vst.msk [vmem:[%s664_s18] sm:$0xff] %vm213_vm0, %v197_v1 }
  0xbc   : > { %v198_v2 = vpop.trf.xlu0 }
  0xbd   : > { %215 = vst.msk [vmem:[%s664_s18 + $0x8] sm:$0xff] %vm213_vm0, %v198_v2 }
  0xc0   : > { %v199_v3 = vpop.trf.xlu0 }
  0xc1   : > { %216 = vst.msk [vmem:[%s664_s18 + $0x10] sm:$0xff] %vm213_vm0, %v199_v3 }
  0xc4   : > { %v200_v4 = vpop.trf.xlu0 }
  0xc5   : > { %217 = vst.msk [vmem:[%s664_s18 + $0x18] sm:$0xff] %vm213_vm0, %v200_v4 }
  0xc8   : > { %v201_v5 = vpop.trf.xlu0 }
  0xc9   : > { %218 = vst.msk [vmem:[%s664_s18 + $0x20] sm:$0xff] %vm213_vm0, %v201_v5 }
  0xcc   : > { %v202_v6 = vpop.trf.xlu0 }
  0xcd   : > { %219 = vst.msk [vmem:[%s664_s18 + $0x28] sm:$0xff] %vm213_vm0, %v202_v6 }
  0xd0   : > { %v203_v7 = vpop.trf.xlu0 }
  0xd1   : > { %220 = vst.msk [vmem:[%s664_s18 + $0x30] sm:$0xff] %vm213_vm0, %v203_v7 }
  0xd4   : > { %v204_v8 = vpop.trf.xlu0 }
  0xd5   : > { %221 = vst.msk [vmem:[%s664_s18 + $0x38] sm:$0xff] %vm213_vm0, %v204_v8 }
  0xd8   : > { %v205_v9 = vpop.trf.xlu0 }
  0xd9   : > { %222 = vst.msk [vmem:[%s664_s18 + $0x40] sm:$0xff] %vm213_vm0, %v205_v9 }
  0xdc   : > { %v206_v10 = vpop.trf.xlu0 }
  0xdd   : > { %223 = vst.msk [vmem:[%s664_s18 + $0x48] sm:$0xff] %vm213_vm0, %v206_v10 }
  0xe0   : > { %v207_v11 = vpop.trf.xlu0 }
  0xe1   : > { %224 = vst.msk [vmem:[%s664_s18 + $0x50] sm:$0xff] %vm213_vm0, %v207_v11 }
  0xe4   : > { %v208_v12 = vpop.trf.xlu0 }
  0xe5   : > { %225 = vst.msk [vmem:[%s664_s18 + $0x58] sm:$0xff] %vm213_vm0, %v208_v12 }
  0xe8   : > { %v209_v13 = vpop.trf.xlu0 }
  0xe9   : > { %226 = vst.msk [vmem:[%s664_s18 + $0x60] sm:$0xff] %vm213_vm0, %v209_v13 }
  0xec   : > { %v210_v14 = vpop.trf.xlu0 }
  0xed   : > { %227 = vst.msk [vmem:[%s664_s18 + $0x68] sm:$0xff] %vm213_vm0, %v210_v14 }
  0xf0   : > { %v211_v15 = vpop.trf.xlu0 }
  0xf1   : > { %228 = vst.msk [vmem:[%s664_s18 + $0x70] sm:$0xff] %vm213_vm0, %v211_v15 }
  0xf4   : > { %v212_v16 = vpop.trf.xlu0 }
  0xf5   : > { %229 = vst.msk [vmem:[%s664_s18 + $0x78] sm:$0xff] %vm213_vm0, %v212_v16 }
  0xf6 PF: > { %s14_s13 = sadd.s32 1, %s524_s13   ;;  %s729_s6 = smov %s500_s7 }
  0xf7   : > { %p11_p7 = scmp.ge.s32.totalorder %s14_s13, 6   ;;  %s730_s7 = smov %s504_s8 }
  0xf8   : > { %s731_s8 = smov %s604_s26  ;;  %s732_s9 = smov %s516_s11 }
  0xf9   : > { %s733_s10 = smov %s520_s12  ;;  %s734_s11 = smov %s737_s15 }
  0xfa   : > { %s735_s12 = smov %s741_s16  ;;  %13 = sbr.rel (!%p11_p7) target bundleno = 5 (0x5), region = 64 }
 0x101   :  { %266 = vsyncpa [#allocation3], 1 }
 0x102   :  { %268 = vsyncpa [#allocation3 + $0x1], 1 }

</bundles_post_ra>
